<compile_context>
chip_gen: v7x
topology: tpu7x:2x2x1
jax: 0.10.0
libtpu: 0.0.40
codegen_flags: <defaults>
</compile_context>

<pallas_src>
import functools

import jax
import jax.numpy as jnp
from jax.experimental import pallas as pl
from jax.experimental.pallas import tpu as pltpu

KERNEL_SIZE = 25
PAD = (KERNEL_SIZE - 1) // 2  # 12


def _zlinear_kernel(x_ref, w_ref, b_ref, o_ref):
    # x_ref: (L, Nt)  input block: time on sublanes, batch*channel on lanes
    # w_ref: (P, L)   folded total weight, resident across the grid
    # b_ref: (P, 1)   folded total bias (f32), resident across the grid
    # o_ref: (P, Nt)  lane-dense output slab
    out = jnp.dot(w_ref[...], x_ref[...], preferred_element_type=jnp.float32)
    o_ref[...] = (out + b_ref[...]).astype(o_ref.dtype)


def _fold_affine(w_seasonal, w_trend, b_seasonal, b_trend, seq_len):
    """Fold pad + moving-average + decomposition + both Linears into one
    affine map per (batch, channel) series: out = W_total @ x + b_total.
    Call ONCE at model init (weights are static at inference)."""
    L = seq_len
    # Replicate-pad matrix Pm: xpad = Pm @ x, Pm is (L + 2*PAD, L).
    idx = jnp.clip(jnp.arange(L + 2 * PAD) - PAD, 0, L - 1)
    Pm = jax.nn.one_hot(idx, L, dtype=jnp.float32)
    # AvgPool1d(kernel=25, stride=1) matrix A: trend = A @ xpad, A is (L, L+2*PAD).
    i = jnp.arange(L)[:, None]
    j = jnp.arange(L + 2 * PAD)[None, :]
    A = jnp.where((j >= i) & (j < i + KERNEL_SIZE), 1.0 / KERNEL_SIZE, 0.0)
    M = A @ Pm                                               # (L, L): trend = M @ x
    ws = w_seasonal.astype(jnp.float32)                      # (P, L)
    wt = w_trend.astype(jnp.float32)                         # (P, L)
    # out = Ws @ (x - trend) + Wt @ trend + bs + bt = (Ws + (Wt - Ws) @ M) @ x + (bs + bt)
    w_total = ws + (wt - ws) @ M                             # (P, L)
    b_total = (b_seasonal + b_trend).astype(jnp.float32)     # (P,)
    return w_total, b_total


@functools.partial(jax.jit, static_argnames=("pred_len", "compute_dtype"))
def zlinear_forward(x, w_total, b_total, *, pred_len, compute_dtype=jnp.float32):
    """x: [B, seq_len, C], w_total: [pred_len, seq_len], b_total: [pred_len]
    -> [B, pred_len, C]."""
    B, L, C = x.shape
    P = pred_len
    N = B * C

    # [B, L, C] -> [L, B*C]: batch*channel lands on the lane / MXU-N dimension.
    x2 = jnp.transpose(x, (1, 0, 2)).reshape(L, N).astype(compute_dtype)
    w = w_total.astype(compute_dtype)
    b = b_total.reshape(P, 1).astype(jnp.float32)

    # Lane tile over N = B*C: lane-dense (multiple of 128) when possible, and
    # >= 2 grid blocks when N allows it so both v7x TensorCores are fed.
    if N > 1024:
        n_tile = 512
    elif N >= 256 and N % 256 == 0:
        n_tile = N // 2
    else:
        n_tile = N  # full-dim block satisfies the (8,128) rule for tiny N
    grid = (pl.cdiv(N, n_tile),)

    itemsize = jnp.dtype(compute_dtype).itemsize
    cost = pl.CostEstimate(
        flops=2 * P * L * N,
        transcendentals=0,
        bytes_accessed=(L * N + P * L) * itemsize + P * 4
                       + P * N * jnp.dtype(x.dtype).itemsize,
    )

    # TODO(synk): pl.Buffered(1) on the resident w/b specs would skip one idle
    # double-buffer (~2 MB at P=L=720); left at defaults to stay conservative.
    out2 = pl.pallas_call(
        _zlinear_kernel,
        out_shape=jax.ShapeDtypeStruct((P, N), x.dtype),
        grid_spec=pltpu.PrefetchScalarGridSpec(
            num_scalar_prefetch=0,
            grid=grid,
            in_specs=[
                pl.BlockSpec((L, n_tile), lambda n: (0, n)),
                pl.BlockSpec((P, L), lambda n: (0, 0)),   # resident weight
                pl.BlockSpec((P, 1), lambda n: (0, 0)),   # resident bias
            ],
            out_specs=pl.BlockSpec((P, n_tile), lambda n: (0, n)),
        ),
        compiler_params=pltpu.CompilerParams(
            dimension_semantics=("parallel",),
            vmem_limit_bytes=64 * 1024 * 1024,
        ),
        cost_estimate=cost,
    )(x2, w, b)

    # [P, B*C] -> [B, P, C]
    return jnp.transpose(out2.reshape(P, B, C), (1, 0, 2))


def _reference(x, w_seasonal, b_seasonal, w_trend, b_trend, pred_len):
    """Pure-JAX reference that mirrors the PyTorch graph op-for-op."""
    front = jnp.repeat(x[:, 0:1, :], PAD, axis=1)
    end = jnp.repeat(x[:, -1:, :], PAD, axis=1)
    xpad = jnp.concatenate([front, x, end], axis=1)          # [B, L+24, C]
    L = x.shape[1]
    windows = jnp.stack([xpad[:, k:k + L, :] for k in range(KERNEL_SIZE)], 0)
    trend = jnp.mean(windows, axis=0)                        # [B, L, C]
    seasonal = x - trend
    s_ncl = jnp.transpose(seasonal, (0, 2, 1))               # [B, C, L]
    t_ncl = jnp.transpose(trend, (0, 2, 1))
    s_out = jnp.einsum("bcl,pl->bcp", s_ncl, w_seasonal) + b_seasonal
    t_out = jnp.einsum("bcl,pl->bcp", t_ncl, w_trend) + b_trend
    return jnp.transpose(s_out + t_out, (0, 2, 1))           # [B, P, C]


def _run_case(key, B, L, C, P, compute_dtype=jnp.float32, atol=1e-5, rtol=1e-5):
    kx, kbs, kbt = jax.random.split(key, 3)
    x = jax.random.normal(kx, (B, L, C), dtype=jnp.float32)
    # Weights as in the PyTorch __init__: (1/seq_len) * ones([pred_len, seq_len]).
    w_seasonal = jnp.full((P, L), 1.0 / L, dtype=jnp.float32)
    w_trend = jnp.full((P, L), 1.0 / L, dtype=jnp.float32)
    # Biases: deterministic stand-in for nn.Linear's default uniform init.
    bound = 1.0 / (L ** 0.5)
    b_seasonal = jax.random.uniform(kbs, (P,), minval=-bound, maxval=bound)
    b_trend = jax.random.uniform(kbt, (P,), minval=-bound, maxval=bound)

    # Fold done ONCE here ("model init"), not on the forward's critical path.
    w_total, b_total = _fold_affine(w_seasonal, w_trend, b_seasonal, b_trend, L)

    out = zlinear_forward(x, w_total, b_total, pred_len=P,
                          compute_dtype=compute_dtype)
    jax.block_until_ready(out)
    ref = _reference(x, w_seasonal, b_seasonal, w_trend, b_trend, P)
    assert out.shape == (B, P, C)
    assert jnp.allclose(out, ref, atol=atol, rtol=rtol), (
        f"mismatch for B={B} L={L} C={C} P={P} dtype={compute_dtype}: "
        f"max abs err {float(jnp.max(jnp.abs(out - ref)))}")


if __name__ == "__main__":
    key = jax.random.PRNGKey(0)
    k1, k2, k3, k4 = jax.random.split(key, 4)
    # Primary small case (lane dim N = B*C = 8, single block).
    _run_case(k1, B=2, L=16, C=4, P=8)
    # Non-multiple-of-8/128 shapes (N = 21) to exercise edge handling.
    _run_case(k2, B=3, L=36, C=7, P=24)
    # N = 256 -> two 128-lane blocks (keeps both v7x TensorCores busy).
    _run_case(k3, B=2, L=32, C=128, P=16)
    # N = 1280 -> three 512-lane blocks, last block lane-masked; bf16 compute.
    _run_case(k4, B=2, L=24, C=640, P=12,
              compute_dtype=jnp.bfloat16, atol=3e-2, rtol=3e-2)
    print("KERNEL_OK")
</pallas_src>

<mosaic_0001>
module attributes {stable_mosaic.version = 11 : i64} {
  func.func @_zlinear_kernel(%arg0: i32, %arg1: memref<16x8xf32, #tpu.memory_space<vmem>>, %arg2: memref<8x16xf32, #tpu.memory_space<vmem>>, %arg3: memref<8x1xf32, #tpu.memory_space<vmem>>, %arg4: memref<8x8xf32, #tpu.memory_space<vmem>>) attributes {dimension_semantics = [#tpu.dimension_semantics<parallel>], iteration_bounds = array<i64: 1>, scalar_prefetch = 0 : i64, scratch_operands = 0 : i64, tpu.core_type = #tpu.core_type<tc>, window_params = [{transform_indices = @transform_0, window_bounds = array<i64: 16, 8>}, {pipeline_mode = #tpu.pipeline_mode<synchronous>, transform_indices = @transform_1, window_bounds = array<i64: 8, 16>}, {pipeline_mode = #tpu.pipeline_mode<synchronous>, transform_indices = @transform_2, window_bounds = array<i64: 8, 1>}, {transform_indices = @transform_3, window_bounds = array<i64: 8, 8>}]} {
    %c0 = arith.constant 0 : index
    %c0_0 = arith.constant 0 : index
    %0 = vector.load %arg2[%c0, %c0_0] : memref<8x16xf32, #tpu.memory_space<vmem>>, vector<8x16xf32>
    %c0_1 = arith.constant 0 : index
    %c0_2 = arith.constant 0 : index
    %1 = vector.load %arg1[%c0_1, %c0_2] : memref<16x8xf32, #tpu.memory_space<vmem>>, vector<16x8xf32>
    %cst = arith.constant dense<0.000000e+00> : vector<8x8xf32>
    %2 = tpu.matmul %0, %1, %cst {dimension_numbers = #tpu.dot_dimension_numbers<[1], [0], [0], [1], [0, 0, 1, 1], [], []>} : vector<8x16xf32>, vector<16x8xf32>, vector<8x8xf32> -> vector<8x8xf32>
    %c0_3 = arith.constant 0 : index
    %c0_4 = arith.constant 0 : index
    %3 = vector.load %arg3[%c0_3, %c0_4] : memref<8x1xf32, #tpu.memory_space<vmem>>, vector<8x1xf32>
    %4 = vector.broadcast %3 : vector<8x1xf32> to vector<8x8xf32>
    %5 = arith.addf %2, %4 : vector<8x8xf32>
    %c0_5 = arith.constant 0 : index
    %c0_6 = arith.constant 0 : index
    %6 = vector.load %arg4[%c0_5, %c0_6] : memref<8x8xf32, #tpu.memory_space<vmem>>, vector<8x8xf32>
    tpu.vector_store %arg4[%c0_5, %c0_6], %5 {strides = array<i32>} : memref<8x8xf32, #tpu.memory_space<vmem>>, vector<8x8xf32>,
    return
  }
  func.func @transform_0(%arg0: i32) -> (i32, i32) {
    %c0_i32 = arith.constant 0 : i32
    %c0_i32_0 = arith.constant 0 : i32
    return %c0_i32, %arg0 : i32, i32
  }
  func.func @transform_1(%arg0: i32) -> (i32, i32) {
    %c0_i32 = arith.constant 0 : i32
    %c0_i32_0 = arith.constant 0 : i32
    %c0_i32_1 = arith.constant 0 : i32
    return %c0_i32, %c0_i32_0 : i32, i32
  }
  func.func @transform_2(%arg0: i32) -> (i32, i32) {
    %c0_i32 = arith.constant 0 : i32
    %c0_i32_0 = arith.constant 0 : i32
    %c0_i32_1 = arith.constant 0 : i32
    return %c0_i32, %c0_i32_0 : i32, i32
  }
  func.func @transform_3(%arg0: i32) -> (i32, i32) {
    %c0_i32 = arith.constant 0 : i32
    %c0_i32_0 = arith.constant 0 : i32
    return %c0_i32, %arg0 : i32, i32
  }
}

</mosaic_0001>

<bundles_post_ra>
// kernel: zlinear_forward.1
= control target key start
LH: loop header
LB: loop body
LE: loop exit
PB: predicated region body
PF: predicated region fallthrough
CT: control target
= control target key end

     0   :  { %8 = vsyncpa [#allocation3], 0  ;;  %s357_s0 = inlined_call_operand.hbm [shape: f32[16,8], index: 0, kind: input, shape index: {}]   ;;  %s358_s1 = inlined_call_operand.hbm [shape: f32[8,16], index: 1, kind: input, shape index: {}]   ;;  %s359_s2 = inlined_call_operand.hbm [shape: f32[8,1], index: 2, kind: input, shape index: {}]   ;;  %s360_s3 = inlined_call_operand.hbm [shape: f32[8,8], index: 3, kind: output, shape index: {}]  }
   0x1   :  { %9 = vsyncpa [#allocation6], 0 }
   0x2   :  { %10 = vsyncpa [#allocation4], 0  ;;  %s272_s12 = smov [#allocation5]   ;;  %s273_s14 = smov [#allocation2]  }
   0x3   :  { %s29_s13 = sshll.u32 %s272_s12, 4  ;;  %s16_s15 = sshll.u32 %s273_s14, 4  ;;  %s30_s13 = int_to_ptr.vmem [resolvable:$true] %s29_s13  ;;  %s302_s15 = int_to_ptr.vmem [resolvable:$true] %s16_s15 }
   0x4   :  { %s178_s18 = scalar_lea.hbm %s358_s1, 128 }
   0x5   :  { %p179_p0 = scmp.ne.s32.totalorder %s358_s1, %s178_s18  ;;  %p182_p1 = scmp.lt.u32.totalorder %s178_s18, %s358_s1 }
   0x7   :  { %p184_p2 = pnand %p182_p1, %p179_p0 }
   0x9   :  { %187 = shalt.err (!%p184_p2)
}
   0xa   :  { %s188_s23 = scalar_lea.vmem %s30_s13, 128  ;;  %p193_p4 = scmp.lt.s32.totalorder %s30_s13, %s30_s13 }
   0xb   :  { %p189_p3 = scmp.ne.s32.totalorder %s30_s13, %s188_s23  ;;  %p194_p5 = scmp.lt.s32.totalorder %s188_s23, %s188_s23 }
   0xd   :  { %p195_p6 = por %p194_p5, %p193_p4 }
   0xf   :  { %p196_p7 = pnand %p195_p6, %p189_p3 }
  0x11   :  { %199 = shalt.err (!%p196_p7)
}
  0x12   :  { %32 = dma.hbm_to_vmem [thread:$0]  %s358_s1, 128, %s30_s13, [#allocation6]  }
  0x13   :  { %s200_s28 = scalar_lea.hbm %s357_s0, 256 }
  0x14   :  { %p201_p8 = scmp.ne.s32.totalorder %s357_s0, %s200_s28  ;;  %p204_p9 = scmp.lt.u32.totalorder %s200_s28, %s357_s0 }
  0x16   :  { %p206_p10 = pnand %p204_p9, %p201_p8 }
  0x18   :  { %209 = shalt.err (!%p206_p10)
}
  0x19   :  { %s210_s6 = scalar_lea.vmem %s302_s15, 256  ;;  %p215_p12 = scmp.lt.s32.totalorder %s302_s15, %s302_s15 }
  0x1a   :  { %p211_p11 = scmp.ne.s32.totalorder %s302_s15, %s210_s6  ;;  %p216_p13 = scmp.lt.s32.totalorder %s210_s6, %s210_s6 }
  0x1c   :  { %p217_p0 = por %p216_p13, %p215_p12 }
  0x1e   :  { %p218_p1 = pnand %p217_p0, %p211_p11 }
  0x20   :  { %221 = shalt.err (!%p218_p1)
}
  0x21   :  { %s274_s1 = smov 128   ;;  %s275_s7 = smov 8  }
  0x22   :  { %22 = dma.hbm_to_vmem [thread:$0]  %s357_s0, 256, %s302_s15, [#allocation3], %s274_s1, %s274_s1, %s275_s7  }
  0x23   :  { %s276_s10 = smov [#allocation7]   ;;  %s222_s14 = scalar_lea.hbm %s359_s2, 128 }
  0x24   :  { %s39_s11 = sshll.u32 %s276_s10, 4  ;;  %p223_p2 = scmp.ne.s32.totalorder %s359_s2, %s222_s14  ;;  %s40_s11 = int_to_ptr.vmem [resolvable:$true] %s39_s11 }
  0x25   :  { %p226_p3 = scmp.lt.u32.totalorder %s222_s14, %s359_s2 }
  0x27   :  { %p228_p4 = pnand %p226_p3, %p223_p2 }
  0x29   :  { %231 = shalt.err (!%p228_p4)
}
  0x2a   :  { %s232_s20 = scalar_lea.vmem %s40_s11, 128  ;;  %p237_p6 = scmp.lt.s32.totalorder %s40_s11, %s40_s11 }
  0x2b   :  { %p233_p5 = scmp.ne.s32.totalorder %s40_s11, %s232_s20  ;;  %p238_p7 = scmp.lt.s32.totalorder %s232_s20, %s232_s20 }
  0x2d   :  { %p239_p8 = por %p238_p7, %p237_p6 }
  0x2f   :  { %p240_p9 = pnand %p239_p8, %p233_p5 }
  0x31   :  { %243 = shalt.err (!%p240_p9)
}
  0x32   :  { %42 = dma.hbm_to_vmem [thread:$0]  %s359_s2, 128, %s40_s11, [#allocation6]  }
  0x33   :  { %266 = dma.done.wait [#allocation3], 256  }
  0x34   :  { %267 = vsyncadd [#allocation3], 4294967040 }
  0x35   :  { %268 = dma.done.wait [#allocation6], 256  }
  0x36   :  { %269 = vsyncadd [#allocation6], 4294967040  ;;  %v277_v0 = vmov 0.0|0.0   ;;  %vm278_vm0 = vmmov 0   ;;  %v279_v1 = vmov 0.0   ;;  %v280_v2 = vmov 0  }
  0x37   :  { %164 = vmatprep.subr.bf16.mxu0 %v277_v0  ;;  %161 = vmatprep.mubr.msk.f32.mxu0 %vm278_vm0, %v279_v1  ;;  %v53_v3 = vld [vmem:[#allocation2] sm:$0xff]  ;;  %v54_v4 = vld [vmem:[#allocation2 + $0x8] sm:$0xff]  ;;  %v55_v6 = vld [vmem:[#allocation7] sm:$0xff]  ;;  %vm61_vm1 = vcmask 130048   ;;  %s281_s2 = smov [#allocation8]   ;;  %vm135_vm2 = vcmask 64512  }
  0x38   :  { %177 = vset.pattern.permute.xlu0 %v280_v2  ;;  %v165_v5 = vpack.c.bf16 %v54_v4, %v53_v3  ;;  %v52_v7 = vld [vmem:[#allocation5] sm:$0xff]  ;;  %s143_s21 = sshll.u32 %s281_s2, 4  ;;  %s144_s21 = int_to_ptr.vmem [resolvable:$true] %s143_s21 }
  0x39   :  { %58 = vperm.xlu0 %177, %v55_v6   ;;  %s244_s22 = scalar_lea.vmem %s144_s21, 128  ;;  %p249_p11 = scmp.lt.s32.totalorder %s144_s21, %s144_s21 }
  0x3a   :  { %166 = vmatpush3.bf16.msra.mxu0 %v165_v5  ;;  %p245_p10 = scmp.ne.s32.totalorder %s144_s21, %s244_s22  ;;  %p250_p12 = scmp.lt.s32.totalorder %s244_s22, %s244_s22 }
  0x3c   :  { %p251_p13 = por %p250_p12, %p249_p11 }
  0x3d   :  { %162 = vmatmul.mubr.msk.f32.vlgmr.msra.gmra.mrb[0].mxu0 %vm61_vm1, %v52_v7 }
  0x3e   :  { %p252_p0 = pnand %p251_p13, %p245_p10 }
  0xb8   :  { %v59_v8 = vpop.permute.xlu0 %58 }
 0x110   :  { %v131_v9 = vpop.f32.mrb[0].mxu0 }
 0x111   :  { %v132_v10 = vadd.f32 %v131_v9, %v59_v8  ;;  %v163_v11 = vpop.f32.mrb[1].mxu0 }
 0x113   :  { %136 = vst.msk [vmem:[#allocation8] sm:$0xff] %vm135_vm2, %v132_v10 }
 0x114   :  { %255 = shalt.err (!%p252_p0)
}
 0x115   :  { %s256_s25 = scalar_lea.hbm %s360_s3, 128 }
 0x116   :  { %p257_p1 = scmp.ne.s32.totalorder %s360_s3, %s256_s25  ;;  %p260_p2 = scmp.lt.u32.totalorder %s256_s25, %s360_s3 }
 0x118   :  { %p262_p3 = pnand %p260_p2, %p257_p1 }
 0x11a   :  { %265 = shalt.err (!%p262_p3)
}
 0x11b   :  { %146 = dma.vmem_to_hbm [thread:$0]  %s144_s21, 128, %s360_s3, [#allocation4]  }
 0x11c   :  { %270 = dma.done.wait [#allocation4], 128  }
 0x11d   :  { %271 = vsyncadd [#allocation4], 4294967168 }
 0x11e   :  { %150 = vsyncpa [#allocation3], 1 }
 0x11f   :  { %151 = vsyncpa [#allocation6], 1 }
 0x120   :  { %152 = vsyncpa [#allocation4], 1 }

</bundles_post_ra>
